<compile_context>
chip_gen: v6e
topology: v6e:2x2x1
jax: 0.10.0
libtpu: 0.0.40
codegen_flags: <defaults>
</compile_context>

<pallas_src>
import jax
import jax.numpy as jnp
from jax import lax
from jax.experimental import pallas as pl
from jax.experimental.pallas import tpu as pltpu


def _leaky(x, slope):
    return jnp.where(x >= 0, x, slope * x)


# --------------------------------------------------------------------------
# kNN pairwise distance kernel (batch folded, channel-last):
#   out[b, s, p] = -|| x[b, p, :] - sel[b, s, :] ||^2
# --------------------------------------------------------------------------
def _pdist_kernel(sel_ref, x_ref, xx_ref, out_ref):
    sel = sel_ref[...]                                               # (B, S, C) f32
    x = x_ref[...]                                                   # (B, P, C) f32
    # bf16 inner product (f32 accumulation) — may perturb neighbour ranking only
    # in rare near-ties; squared norms stay f32.
    inner = jnp.einsum("bsc,bpc->bsp",
                       sel.astype(jnp.bfloat16), x.astype(jnp.bfloat16),
                       preferred_element_type=jnp.float32)           # (B, S, P)
    xx2 = jnp.sum(sel * sel, axis=-1, keepdims=True)                 # (B, S, 1)
    out_ref[...] = 2.0 * inner - xx_ref[...] - xx2


def pairwise_neg_sqdist(x, sel):
    # x: (B, P, C), sel: (B, S, C) channel-last.  Returns (B, S, P).
    B, P, C = x.shape
    S = sel.shape[1]
    xx = jnp.sum(x * x, axis=-1)[:, None, :]                         # (B, 1, P) glue
    return pl.pallas_call(
        _pdist_kernel,
        out_shape=jax.ShapeDtypeStruct((B, S, P), jnp.float32),
        grid=(1,),
        in_specs=[pl.BlockSpec((B, S, C), lambda i: (0, 0, 0)),
                  pl.BlockSpec((B, P, C), lambda i: (0, 0, 0)),
                  pl.BlockSpec((B, 1, P), lambda i: (0, 0, 0))],
        out_specs=pl.BlockSpec((B, S, P), lambda i: (0, 0, 0)),
        compiler_params=pltpu.CompilerParams(
            dimension_semantics=("arbitrary",)),
    )(sel, x, xx)


def knn(x, sel, k):
    # torch: pairwise_distance.topk(k, dim=-2)[1] -> (B, k, S)
    pd = pairwise_neg_sqdist(x, sel)                                 # (B, S, P)
    _, idx = lax.top_k(pd, k)                                        # (B, S, k)
    return jnp.transpose(idx, (0, 2, 1))                             # (B, k, S)


# --------------------------------------------------------------------------
# Dynamic_sampling (random subsample + kNN gather) — sampling/gather is glue.
# Channel-last x: (B, P, C).  Returns torch's exact gathered view (B, S, K, C).
# --------------------------------------------------------------------------
def dynamic_sampling(x, s_num, k, key):
    B, P, C = x.shape
    assert s_num <= P, "only the s_num <= P branch is exercised"
    # TODO(synk): Is_temp branch and the s_num > P duplication branch of
    # Dynamic_sampling are not implemented (unused in this forward config).
    rand = jax.random.uniform(key, (B, P), dtype=jnp.float32)        # torch.rand
    perm = jnp.argsort(rand, axis=1)[:, :s_num]                      # (B, S)
    sel = jnp.take_along_axis(
        x, jnp.broadcast_to(perm[:, :, None], (B, s_num, C)), axis=1)  # (B, S, C)
    if C == 4:
        idx = knn(x[..., :3], sel[..., :3], k)
    else:
        idx = knn(x, sel, k)
    idx = idx + jnp.arange(B, dtype=idx.dtype)[:, None, None] * P
    idx_flat = idx.reshape(-1)                                       # (B*k*S,)
    # channel-last x.reshape(B*P, C) == torch's x.transpose(2,1).view(B*P, C);
    # the (B, s_num, k, C) view reinterprets the (b, k, s) gather order exactly
    # like the torch reference.
    feature = x.reshape(B * P, C)[idx_flat].reshape(B, s_num, k, C)
    return feature                                                   # (B, S, K, C)


# --------------------------------------------------------------------------
# Fused per-layer kernel, batch folded, transposed (channel-last) layout.
#   Activation rows are (b, k, s)-major; output block (B, S, outc) is lane-dense.
# --------------------------------------------------------------------------
def _make_layer_kernel(B, K, S, inc, outc, groups):
    Co2 = outc // 2
    cg = Co2 // groups
    G = groups
    M = K * S                       # per-batch spatial extent
    N = B * M
    inv_count = 1.0 / float(M * cg)

    def kernel(pemb_ref, xin_ref, xin0_ref,
               wpe_ref, gpe_g_ref, gpe_b_ref,
               wconv_ref, gc_g_ref, gc_b_ref,
               e2_ref, et2_ref,
               wa1xc_ref, wa1pe_ref, wa2_ref,
               wb1xc_ref, wb1pe_ref, wb2_ref,
               out_ref):
        pemb = pemb_ref[...].reshape(N, 10)           # bf16, rows (b, k, s)-major
        xin = xin_ref[...].reshape(N, inc)            # bf16
        xin0 = xin0_ref[...].reshape(B * S, inc)      # bf16
        E2 = e2_ref[...]                              # (2*Co2, 2*G) f32 block-diag
        ET2 = et2_ref[...]                            # (2*G, 2*Co2) f32 block-diag

        def groupnorm(v, gamma, beta):
            # v: (N, Co2) f32.  Per-batch GroupNorm over (K*S, cg) elements,
            # single-pass sum / sum-of-squares; both stats folded to groups with
            # ONE dot against the block-diagonal indicator matrix.
            vb = v.reshape(B, M, Co2)
            s1 = jnp.sum(vb, axis=1)                                  # (B, Co2)
            s2 = jnp.sum(vb * vb, axis=1)                             # (B, Co2)
            gsum = jnp.dot(jnp.concatenate([s1, s2], axis=-1), E2,
                           preferred_element_type=jnp.float32)        # (B, 2G)
            mean = gsum[:, :G] * inv_count                            # (B, G)
            var = jnp.maximum(gsum[:, G:] * inv_count - mean * mean, 0.0)
            inv = lax.rsqrt(var + 1e-5)                               # (B, G)
            mexp = jnp.dot(jnp.concatenate([mean, inv], axis=-1), ET2,
                           preferred_element_type=jnp.float32)        # (B, 2*Co2)
            mean_c, inv_c = mexp[:, :Co2], mexp[:, Co2:]
            scale = gamma * inv_c                                     # (B, Co2)
            bias = beta - mean_c * scale
            return vb * scale[:, None, :] + bias[:, None, :]          # (B, M, Co2)

        # PosEncoding branch: 1x1 conv + GroupNorm + LeakyReLU(0.2) -> bf16
        pe = jnp.dot(pemb, wpe_ref[...], preferred_element_type=jnp.float32)
        pe = _leaky(groupnorm(pe, gpe_g_ref[...], gpe_b_ref[...]), 0.2)
        pe = pe.astype(jnp.bfloat16)                                  # (B, M, Co2)

        # conv branch: 1x1 conv + GroupNorm + LeakyReLU(0.2) -> bf16
        xc = jnp.dot(xin, wconv_ref[...], preferred_element_type=jnp.float32)
        xc = _leaky(groupnorm(xc, gc_g_ref[...], gc_b_ref[...]), 0.2)
        xc = xc.astype(jnp.bfloat16)                                  # (B, M, Co2)

        # attention MLP on feat = [xc | pe] (wa1 column-split on the host)
        a1 = jnp.dot(xc.reshape(N, Co2), wa1xc_ref[...],
                     preferred_element_type=jnp.float32)
        a1 = a1 + jnp.dot(pe.reshape(N, Co2), wa1pe_ref[...],
                          preferred_element_type=jnp.float32)
        a1 = _leaky(a1, 0.2)                                          # (N, 32)
        # (1, 32) projection on the VPU (multiply + lane reduce), off the MXU.
        logits = jnp.sum(a1 * wa2_ref[...], axis=1, keepdims=True)    # (N, 1)

        # softmax over the K neighbours; weights normalised once.
        lg = logits.reshape(B, K, S, 1)
        m = jnp.max(lg, axis=1, keepdims=True)
        e = jnp.exp(lg - m)                                           # (B, K, S, 1)
        denom = jnp.sum(e, axis=1, keepdims=True)                     # (B, 1, S, 1)
        e = e * pl.reciprocal(denom, approx=True)

        # attention-weighted sum over K (bf16 values, f32 weights / accumulation)
        fsum_xc = jnp.sum(xc.reshape(B, K, S, Co2) * e, axis=1)       # (B, S, Co2)
        fsum_pe = jnp.sum(pe.reshape(B, K, S, Co2) * e, axis=1)

        # Branch1 (column-split halves of wb1) + Branch2, LeakyReLU(0.1)
        fea = jnp.dot(fsum_xc.reshape(B * S, Co2).astype(jnp.bfloat16),
                      wb1xc_ref[...], preferred_element_type=jnp.float32)
        fea = fea + jnp.dot(fsum_pe.reshape(B * S, Co2).astype(jnp.bfloat16),
                            wb1pe_ref[...], preferred_element_type=jnp.float32)
        fea = fea + jnp.dot(xin0, wb2_ref[...],
                            preferred_element_type=jnp.float32)
        out_ref[...] = _leaky(fea, 0.1).reshape(B, S, outc)           # lane-dense

    return kernel


def _vmem_limit_bytes(operands, out_bytes, B, K, S, Co2, outc):
    # Tight-ish, generously padded estimate (inputs possibly double-buffered +
    # in-kernel intermediates), clamped so it can never under-provision here.
    n = B * K * S
    in_bytes = sum(int(a.size) * a.dtype.itemsize for a in operands)
    inter = (n * Co2 * 6 * 2                 # pe / xc: f32 during GN + bf16 after
             + n * (32 + 8) * 4              # attention MLP + softmax scalars
             + B * S * (2 * Co2 + outc) * 6)  # fsum (f32 + bf16) + fea
    est = 2 * (in_bytes + out_bytes) + 2 * inter + (6 << 20)
    return int(min(max(est, 16 << 20), 112 << 20))


def feature_extraction_layer(x, params, s_num, k, key):
    # x: (B, P, C) channel-last.  Returns (B, s_num, 4 + outc) channel-last.
    B, P, C = x.shape
    inc, outc, groups = params["inc"], params["outc"], params["group"]
    Co2 = outc // 2
    S, K = s_num, k

    x1 = dynamic_sampling(x, s_num, k, key)              # (B, S, K, C)
    x1_kc = jnp.transpose(x1, (0, 2, 1, 3))              # (B, K, S, C) k-major rows

    # positional-embedding inputs (10 channels) — elementwise glue
    PA = x1_kc[..., :3]                                  # (B, K, S, 3)
    PC = x1_kc[:, 0:1, :, :3]                            # (B, 1, S, 3)
    diff = PA - PC
    temp = jnp.sqrt(jnp.sum(diff * diff, axis=-1, keepdims=True))
    pembT = jnp.concatenate(
        [PA, jnp.broadcast_to(PC, PA.shape), diff, temp], axis=-1)   # (B, K, S, 10)
    pembT = pembT.astype(jnp.bfloat16)

    x_in = x1_kc if C == 4 else x1_kc[..., 4:]
    assert x_in.shape[-1] == inc
    xinT = x_in.astype(jnp.bfloat16)                     # (B, K, S, inc)
    xin0T = x_in[:, 0].astype(jnp.bfloat16)              # (B, S, inc)

    operands = (pembT, xinT, xin0T,
                params["wpeT"], params["gpe_g"], params["gpe_b"],
                params["wconvT"], params["gc_g"], params["gc_b"],
                params["E2"], params["ET2"],
                params["wa1_xcT"], params["wa1_peT"], params["wa2"],
                params["wb1_xcT"], params["wb1_peT"], params["wb2T"])
    out_bytes = B * S * outc * 4
    vmem_limit = _vmem_limit_bytes(operands, out_bytes, B, K, S, Co2, outc)

    # All blocks are full arrays (B folded); constant weights are fetched exactly
    # once since the grid has a single step, so no double-buffer waste applies.
    def _full(a):
        nd = a.ndim
        return pl.BlockSpec(a.shape, lambda i, _nd=nd: (0,) * _nd)

    kernel = _make_layer_kernel(B, K, S, inc, outc, groups)
    out = pl.pallas_call(
        kernel,
        out_shape=jax.ShapeDtypeStruct((B, S, outc), jnp.float32),
        grid=(1,),                                        # batch folded: one launch
        in_specs=[_full(a) for a in operands],
        out_specs=pl.BlockSpec((B, S, outc), lambda i: (0, 0, 0)),
        compiler_params=pltpu.CompilerParams(
            dimension_semantics=("arbitrary",),
            vmem_limit_bytes=vmem_limit),
    )(*operands)

    head = x1[:, :, 0, :4]                                # (B, S, 4) f32
    return jnp.concatenate([head, out], axis=-1)          # (B, S, 4 + outc)


# --------------------------------------------------------------------------
# Parameter init (deterministic, synthetic) with the split / transposed / bf16
# weight layout the kernel expects, plus the full 4-layer model.
# --------------------------------------------------------------------------
def init_layer_params(key, inc, outc, group):
    Co2 = outc // 2
    cg = Co2 // group
    ks = jax.random.split(key, 6)

    def w(kk, co, ci):
        return jax.random.normal(kk, (co, ci), jnp.float32) / jnp.sqrt(float(ci))

    wpe = w(ks[0], Co2, 10)          # PosEncoding 1x1 conv
    wconv = w(ks[1], Co2, inc)       # conv 1x1
    wa1 = w(ks[2], 32, outc)         # attention conv 1
    wa2 = w(ks[3], 1, 32)            # attention conv 2
    wb1 = w(ks[4], outc, outc)       # Branch1
    wb2 = w(ks[5], outc, inc)        # Branch2

    # Group indicator fold/expand matrices, doubled block-diagonally so the
    # GroupNorm [sum|sum_sq] and [mean|inv_std] micro-dots each hit the MXU once.
    ch_group = jnp.arange(Co2) // cg
    E = (ch_group[:, None] == jnp.arange(group)[None, :]).astype(jnp.float32)
    Z = jnp.zeros_like(E)
    E2 = jnp.concatenate([jnp.concatenate([E, Z], axis=1),
                          jnp.concatenate([Z, E], axis=1)], axis=0)   # (2Co2, 2G)
    ET2 = E2.T                                                         # (2G, 2Co2)

    bf = jnp.bfloat16
    return dict(
        inc=inc, outc=outc, group=group,
        wpeT=wpe.T.astype(bf),                      # (10, Co2)
        gpe_g=jnp.ones((1, Co2), jnp.float32),
        gpe_b=jnp.zeros((1, Co2), jnp.float32),
        wconvT=wconv.T.astype(bf),                  # (inc, Co2)
        gc_g=jnp.ones((1, Co2), jnp.float32),
        gc_b=jnp.zeros((1, Co2), jnp.float32),
        E2=E2, ET2=ET2,
        wa1_xcT=wa1[:, :Co2].T.astype(bf),          # (Co2, 32)
        wa1_peT=wa1[:, Co2:].T.astype(bf),          # (Co2, 32)
        wa2=wa2,                                    # (1, 32) f32
        wb1_xcT=wb1[:, :Co2].T.astype(bf),          # (Co2, outc)
        wb1_peT=wb1[:, Co2:].T.astype(bf),          # (Co2, outc)
        wb2T=wb2.T.astype(bf),                      # (inc, outc)
    )


def feature_extraction(x, params_list, sample_keys, out_num=256,
                       ratio_list=(0.1, 0.05, 0.025)):
    # x: (B, C, P) channel-first (torch layout); carried channel-last internally
    # so the per-layer output / gather / kNN transposes disappear.
    B, C, P = x.shape
    s_list = [max(int(P * ratio_list[0]), out_num),
              max(int(P * ratio_list[1]), out_num),
              max(int(P * ratio_list[2]), out_num),
              int(out_num)]
    k_list = [12, 12, 12, 4]
    xT = jnp.transpose(x, (0, 2, 1))                 # (B, P, C) channel-last
    for i in range(4):
        xT = feature_extraction_layer(xT, params_list[i], s_list[i], k_list[i],
                                      sample_keys[i])
    return jnp.transpose(xT, (0, 2, 1))              # back to torch (B, C, P)


if __name__ == "__main__":
    key = jax.random.PRNGKey(0)
    kx, kp, ks = jax.random.split(key, 3)

    B, C, P = 2, 4, 64          # small point cloud: batch=2, 4 channels, 64 points
    out_num = 16                # small sampled-point count (all layers sample 16)

    x = jax.random.normal(kx, (B, C, P), jnp.float32)

    layer_cfg = [(4, 128, 4), (128, 256, 16), (256, 512, 16), (512, 1024, 16)]
    pkeys = jax.random.split(kp, 4)
    params_list = [init_layer_params(pkeys[i], *layer_cfg[i]) for i in range(4)]
    sample_keys = jax.random.split(ks, 4)

    out = feature_extraction(x, params_list, sample_keys, out_num=out_num)
    out = jax.block_until_ready(out)

    assert out.shape == (B, 4 + 1024, out_num), out.shape
    assert not bool(jnp.isnan(out).any())
    print("KERNEL_OK")
</pallas_src>

<mosaic_0001>
module attributes {stable_mosaic.version = 11 : i64} {
  func.func @_pdist_kernel(%arg0: i32, %arg1: memref<2x16x3xf32, #tpu.memory_space<vmem>>, %arg2: memref<2x64x3xf32, #tpu.memory_space<vmem>>, %arg3: memref<2x1x64xf32, #tpu.memory_space<vmem>>, %arg4: memref<2x16x64xf32, #tpu.memory_space<vmem>>) attributes {dimension_semantics = [#tpu.dimension_semantics<arbitrary>], iteration_bounds = array<i64: 1>, scalar_prefetch = 0 : i64, scratch_operands = 0 : i64, tpu.core_type = #tpu.core_type<tc>, window_params = [{pipeline_mode = #tpu.pipeline_mode<synchronous>, transform_indices = @transform_0, window_bounds = array<i64: 2, 16, 3>}, {pipeline_mode = #tpu.pipeline_mode<synchronous>, transform_indices = @transform_1, window_bounds = array<i64: 2, 64, 3>}, {pipeline_mode = #tpu.pipeline_mode<synchronous>, transform_indices = @transform_2, window_bounds = array<i64: 2, 1, 64>}, {pipeline_mode = #tpu.pipeline_mode<synchronous>, transform_indices = @transform_3, window_bounds = array<i64: 2, 16, 64>}]} {
    %c0 = arith.constant 0 : index
    %c0_0 = arith.constant 0 : index
    %c0_1 = arith.constant 0 : index
    %0 = vector.load %arg1[%c0, %c0_0, %c0_1] : memref<2x16x3xf32, #tpu.memory_space<vmem>>, vector<2x16x3xf32>
    %c0_2 = arith.constant 0 : index
    %c0_3 = arith.constant 0 : index
    %c0_4 = arith.constant 0 : index
    %1 = vector.load %arg2[%c0_2, %c0_3, %c0_4] : memref<2x64x3xf32, #tpu.memory_space<vmem>>, vector<2x64x3xf32>
    %2 = arith.truncf %0 : vector<2x16x3xf32> to vector<2x16x3xbf16>
    %3 = arith.truncf %1 : vector<2x64x3xf32> to vector<2x64x3xbf16>
    "tpu.trace_start"() <{level = 10 : i32, message = "bsc,bpc->bsp"}> : () -> ()
    %cst = arith.constant dense<0.000000e+00> : vector<2x16x64xf32>
    %4 = tpu.matmul %2, %3, %cst {dimension_numbers = #tpu.dot_dimension_numbers<[2], [2], [1], [1], [0, 0, 0, 1, 1, 1], [0], [0]>} : vector<2x16x3xbf16>, vector<2x64x3xbf16>, vector<2x16x64xf32> -> vector<2x16x64xf32>
    "tpu.trace_stop"() : () -> ()
    %5 = arith.mulf %0, %0 : vector<2x16x3xf32>
    %cst_5 = arith.constant dense<0.000000e+00> : vector<2x16xf32>
    %6 = vector.multi_reduction <add>, %5, %cst_5 [2] : vector<2x16x3xf32> to vector<2x16xf32>
    %7 = vector.shape_cast %6 : vector<2x16xf32> to vector<2x16x1xf32>
    %cst_6 = arith.constant 2.000000e+00 : f32
    %8 = vector.broadcast %cst_6 : f32 to vector<2x16x64xf32>
    %9 = arith.mulf %8, %4 : vector<2x16x64xf32>
    %c0_7 = arith.constant 0 : index
    %c0_8 = arith.constant 0 : index
    %c0_9 = arith.constant 0 : index
    %10 = vector.load %arg3[%c0_7, %c0_8, %c0_9] : memref<2x1x64xf32, #tpu.memory_space<vmem>>, vector<2x1x64xf32>
    %11 = vector.broadcast %10 : vector<2x1x64xf32> to vector<2x16x64xf32>
    %12 = arith.subf %9, %11 : vector<2x16x64xf32>
    %13 = vector.broadcast %7 : vector<2x16x1xf32> to vector<2x16x64xf32>
    %14 = arith.subf %12, %13 : vector<2x16x64xf32>
    %c0_10 = arith.constant 0 : index
    %c0_11 = arith.constant 0 : index
    %c0_12 = arith.constant 0 : index
    %15 = vector.load %arg4[%c0_10, %c0_11, %c0_12] : memref<2x16x64xf32, #tpu.memory_space<vmem>>, vector<2x16x64xf32>
    tpu.vector_store %arg4[%c0_10, %c0_11, %c0_12], %14 {strides = array<i32>} : memref<2x16x64xf32, #tpu.memory_space<vmem>>, vector<2x16x64xf32>,
    return
  }
  func.func @transform_0(%arg0: i32) -> (i32, i32, i32) {
    %c0_i32 = arith.constant 0 : i32
    %c0_i32_0 = arith.constant 0 : i32
    %c0_i32_1 = arith.constant 0 : i32
    %c0_i32_2 = arith.constant 0 : i32
    return %c0_i32, %c0_i32_0, %c0_i32_1 : i32, i32, i32
  }
  func.func @transform_1(%arg0: i32) -> (i32, i32, i32) {
    %c0_i32 = arith.constant 0 : i32
    %c0_i32_0 = arith.constant 0 : i32
    %c0_i32_1 = arith.constant 0 : i32
    %c0_i32_2 = arith.constant 0 : i32
    return %c0_i32, %c0_i32_0, %c0_i32_1 : i32, i32, i32
  }
  func.func @transform_2(%arg0: i32) -> (i32, i32, i32) {
    %c0_i32 = arith.constant 0 : i32
    %c0_i32_0 = arith.constant 0 : i32
    %c0_i32_1 = arith.constant 0 : i32
    %c0_i32_2 = arith.constant 0 : i32
    return %c0_i32, %c0_i32_0, %c0_i32_1 : i32, i32, i32
  }
  func.func @transform_3(%arg0: i32) -> (i32, i32, i32) {
    %c0_i32 = arith.constant 0 : i32
    %c0_i32_0 = arith.constant 0 : i32
    %c0_i32_1 = arith.constant 0 : i32
    %c0_i32_2 = arith.constant 0 : i32
    return %c0_i32, %c0_i32_0, %c0_i32_1 : i32, i32, i32
  }
}

</mosaic_0001>

<bundles_post_ra>
// kernel: tpu_custom_call.1
= control target key start
LH: loop header
LB: loop body
LE: loop exit
PB: predicated region body
PF: predicated region fallthrough
CT: control target
= control target key end

     0   :  { %vm46_vm0 = vcmask 23552   ;;  %v287_v3 = vmov 0.0   ;;  %vm288_vm1 = vmmov 0   ;;  %s399_s0 = inlined_call_operand.vmem [shape: f32[2,16,3], index: 0, kind: input, shape index: {}]   ;;  %s400_s1 = inlined_call_operand.vmem [shape: f32[2,64,3], index: 1, kind: input, shape index: {}]   ;;  %s401_s2 = inlined_call_operand.vmem [shape: f32[2,1,64], index: 2, kind: input, shape index: {}]   ;;  %s402_s3 = inlined_call_operand.hbm [shape: f32[2,16,64], index: 3, kind: output, shape index: {}]  }
   0x1   :  { %v26_v0 = vld [vmem:[%s400_s1 + $0x30] sm:$0xff]  ;;  %v27_v1 = vld [vmem:[%s400_s1 + $0x38] sm:$0xff]  ;;  %236 = vmatprep.subr.bf16.mxu0 %v287_v3  ;;  %248 = vmatprep.subr.bf16.mxu1 %v287_v3  ;;  %v24_v7 = vld [vmem:[%s400_s1 + $0x20] sm:$0xff] }
   0x2   :  { %v34_v2 = vld [vmem:[%s400_s1 + $0x70] sm:$0xff]  ;;  %v41_v4 = vpack.c.bf16 %v27_v1, %v26_v0  ;;  %v35_v5 = vld [vmem:[%s400_s1 + $0x78] sm:$0xff]  ;;  %v25_v8 = vld [vmem:[%s400_s1 + $0x28] sm:$0xff]  ;;  %244 = vmatprep.mubr.msk.bf16.mxu0 %vm288_vm1, %v287_v3  ;;  %256 = vmatprep.mubr.msk.bf16.mxu1 %vm288_vm1, %v287_v3 }
   0x3   :  { %v45_v6 = vpack.c.bf16 %v35_v5, %v34_v2  ;;  %v32_v10 = vld [vmem:[%s400_s1 + $0x60] sm:$0xff]  ;;  %v33_v11 = vld [vmem:[%s400_s1 + $0x68] sm:$0xff]  ;;  %v40_v13 = vpack.c.bf16 %v25_v8, %v24_v7  ;;  %v18_v16 = vld [vmem:[%s399_s0 + $0x10] sm:$0xff] }
   0x4   :  { %v60_v9 = vsel %vm46_vm0, %v41_v4, 0  ;;  %v44_v14 = vpack.c.bf16 %v33_v11, %v32_v10  ;;  %v16_v15 = vld [vmem:[%s399_s0] sm:$0xff] }
   0x5   :  { %237 = vmatpush3.bf16.xpose.msra.mxu0 %v60_v9  ;;  %v116_v12 = vsel %vm46_vm0, %v45_v6, 0 }
   0x6   :  { %249 = vmatpush3.bf16.xpose.msra.mxu1 %v116_v12  ;;  %238 = vmatprep.subr.bf16.mxu0 %v287_v3 }
   0x7   :  { %250 = vmatprep.subr.bf16.mxu1 %v287_v3 }
   0x8   :  { %8 = vsyncpa [#allocation3], 0  ;;  %v17_v17 = vld [vmem:[%s399_s0 + $0x8] sm:$0xff]  ;;  %v19_v18 = vld [vmem:[%s399_s0 + $0x18] sm:$0xff]  ;;  %v161_v19 = vmul.f32 %v18_v16, %v18_v16  ;;  %v159_v20 = vmul.f32 %v16_v15, %v16_v15  ;;  %v57_v23 = vsel %vm46_vm0, %v40_v13, 0  ;;  %v113_v26 = vsel %vm46_vm0, %v44_v14, 0 }
   0x9   :  { %v162_v21 = vmul.f32 %v19_v18, %v19_v18  ;;  %v160_v22 = vmul.f32 %v17_v17, %v17_v17  ;;  %v22_v27 = vld [vmem:[%s400_s1 + $0x10] sm:$0xff]  ;;  %v23_v28 = vld [vmem:[%s400_s1 + $0x18] sm:$0xff]  ;;  %v20_v37 = vld [vmem:[%s400_s1] sm:$0xff]  ;;  %v36_v45 = vpack.c.bf16 %v17_v17, %v16_v15  ;;  %v37_v46 = vpack.c.bf16 %v19_v18, %v18_v16  ;;  %s289_s27 = smov [#allocation2]  }
   0xa   :  { %v169_v24 = vsel %vm46_vm0, %v161_v19, 0.0  ;;  %v163_v25 = vsel %vm46_vm0, %v159_v20, 0.0  ;;  %v30_v29 = vld [vmem:[%s400_s1 + $0x50] sm:$0xff]  ;;  %v31_v30 = vld [vmem:[%s400_s1 + $0x58] sm:$0xff]  ;;  %v39_v33 = vpack.c.bf16 %v23_v28, %v22_v27  ;;  %v21_v38 = vld [vmem:[%s400_s1 + $0x8] sm:$0xff]  ;;  %vm201_vm2 = vcmask 523264  }
   0xb   :  { %170 = vadd.xlane.f32.xlu1 %v169_v24  ;;  %164 = vadd.xlane.f32.xlu0 %v163_v25  ;;  %v172_v31 = vsel %vm46_vm0, %v162_v21, 0.0  ;;  %v166_v32 = vsel %vm46_vm0, %v160_v22, 0.0  ;;  %v43_v34 = vpack.c.bf16 %v31_v30, %v30_v29  ;;  %v28_v39 = vld [vmem:[%s400_s1 + $0x40] sm:$0xff]  ;;  %v29_v40 = vld [vmem:[%s400_s1 + $0x48] sm:$0xff]  ;;  %v38_v41 = vpack.c.bf16 %v21_v38, %v20_v37  ;;  %s211_s28 = sshll.u32 %s289_s27, 4  ;;  %s212_s28 = int_to_ptr.vmem [resolvable:$true] %s211_s28 }
   0xc   :  { %v54_v35 = vsel %vm46_vm0, %v39_v33, 0  ;;  %v42_v42 = vpack.c.bf16 %v29_v40, %v28_v39  ;;  %v224_v48 = vld [vmem:[%s401_s2] ss:$0 sm:$0xff]  ;;  %v225_v52 = vld [vmem:[%s401_s2 + $0x1] ss:$0 sm:$0xff]  ;;  %s265_s2 = scalar_lea.vmem %s212_s28, 512  ;;  %p270_p1 = scmp.lt.s32.totalorder %s212_s28, %s212_s28 }
   0xd   :  { %239 = vmatpush3.bf16.xpose.msra.mxu0 %v57_v23  ;;  %v110_v36 = vsel %vm46_vm0, %v43_v34, 0  ;;  %v51_v43 = vsel %vm46_vm0, %v38_v41, 0  ;;  %p266_p0 = scmp.ne.s32.totalorder %s212_s28, %s265_s2  ;;  %p271_p2 = scmp.lt.s32.totalorder %s265_s2, %s265_s2 }
   0xe   :  { %251 = vmatpush3.bf16.xpose.msra.mxu1 %v113_v26  ;;  %240 = vmatprep.subr.bf16.mxu0 %v287_v3  ;;  %v107_v44 = vsel %vm46_vm0, %v42_v42, 0 }
   0xf   :  { %252 = vmatprep.subr.bf16.mxu1 %v287_v3  ;;  %173 = vadd.xlane.f32.xlu1 %v172_v31  ;;  %p272_p3 = por %p271_p2, %p270_p1 }
  0x10   :  { %167 = vadd.xlane.f32.xlu0 %v166_v32 }
  0x11   :  { %p273_p4 = pnand %p272_p3, %p266_p0 }
  0x15   :  { %241 = vmatpush3.bf16.xpose.msra.mxu0 %v54_v35 }
  0x16   :  { %253 = vmatpush3.bf16.xpose.msra.mxu1 %v110_v36  ;;  %242 = vmatprep.subr.bf16.mxu0 %v287_v3 }
  0x17   :  { %254 = vmatprep.subr.bf16.mxu1 %v287_v3 }
  0x1d   :  { %243 = vmatpush3.bf16.xpose.msra.mxu0 %v51_v43 }
  0x1e   :  { %255 = vmatpush3.bf16.xpose.msra.mxu1 %v107_v44 }
  0x24   :  { %245 = vmatmul.mubr.msk.bf16.vlgmr.msra.gmra.mxu0 %vm46_vm0, %v36_v45 }
  0x25   :  { %257 = vmatmul.mubr.msk.bf16.vlgmr.msra.gmra.mxu1 %vm46_vm0, %v37_v46 }
  0x94   :  { %v165_v49 = vpop.xlane.xlu0 %164  ;;  %v171_v53 = vpop.xlane.xlu1 %170 }
  0x98   :  { %v174_v4 = vpop.xlane.xlu1 %173 }
  0x99   :  { %v168_v2 = vpop.xlane.xlu0 %167 }
  0xe4   :  { %v96_v47 = vpop.f32.mrf.mxu0 }
  0xe5   :  { %v175_v50 = vmul.f32 2.0, %v96_v47  ;;  %v152_v51 = vpop.f32.mrf.mxu1 }
  0xe6   :  { %v177_v54 = vmul.f32 2.0, %v152_v51  ;;  %v246_v55 = vpop.f32.mrf.mxu0 }
  0xe7   :  { %v258_v56 = vpop.f32.mrf.mxu1  ;;  %v193_v57 = vsub.f32 %v175_v50, %v224_v48 }
  0xe8   :  { %v195_v58 = vsub.f32 %v177_v54, %v225_v52  ;;  %v99_v59 = vpop.f32.mrf.mxu0 }
  0xe9   :  { %v155_v60 = vpop.f32.mrf.mxu1  ;;  %v197_v61 = vsub.f32 %v193_v57, %v165_v49  ;;  %v176_v62 = vmul.f32 2.0, %v99_v59 }
  0xea   :  { %v199_v63 = vsub.f32 %v195_v58, %v171_v53  ;;  %v178_v0 = vmul.f32 2.0, %v155_v60  ;;  %v247_v1 = vpop.f32.mrf.mxu0 }
  0xeb   :  { %202 = vst.msk [vmem:[#allocation2] sm:$0xff] %vm201_vm2, %v197_v61  ;;  %v259_v3 = vpop.f32.mrf.mxu1  ;;  %v194_v5 = vsub.f32 %v176_v62, %v224_v48 }
  0xec   :  { %204 = vst.msk [vmem:[#allocation2 + $0x10] sm:$0xff] %vm201_vm2, %v199_v63  ;;  %v196_v6 = vsub.f32 %v178_v0, %v225_v52 }
  0xed   :  { %v198_v7 = vsub.f32 %v194_v5, %v168_v2 }
  0xee   :  { %v200_v8 = vsub.f32 %v196_v6, %v174_v4 }
  0xef   :  { %203 = vst.msk [vmem:[#allocation2 + $0x8] sm:$0xff] %vm201_vm2, %v198_v7 }
  0xf0   :  { %205 = vst.msk [vmem:[#allocation2 + $0x18] sm:$0xff] %vm201_vm2, %v200_v8 }
  0xf1   :  { %276 = shalt.err (!%p273_p4)
}
  0xf2   :  { %s290_s29 = smov 128   ;;  %s291_s30 = smov 8  }
  0xf3   :  { %217 = dma.vmem_to_hbm [thread:$0]  %s212_s28, 512, %s402_s3, [#allocation3], %s290_s29, %s290_s29, %s291_s30  }
  0xf4   :  { %285 = dma.done.wait [#allocation3], 512  }
  0xf5   :  { %286 = vsyncadd [#allocation3], 4294966784 }
  0xf6   :  { %221 = vsyncpa [#allocation3], 1 }

</bundles_post_ra>
